<compile_context>
chip_gen: v7x
topology: tpu7x:2x2x1
jax: 0.10.0
libtpu: 0.0.40
codegen_flags: <defaults>
</compile_context>

<pallas_src>
import jax
import jax.numpy as jnp
from jax.experimental import pallas as pl
from jax.experimental.pallas import tpu as pltpu

# ---------------- hyper-parameters (small, consistent with the module) ----------------
B = 2            # batch
C = 4            # input channels (enc_in)
SEQ_LEN = 72     # input sequence length
PATCH_LEN = 16   # expConfig['patch_len']
PATCH_NUM = 8    # args['patch_num']
D_MODEL = 32     # encoder hidden width
PRED_LEN = 24    # forecast horizon produced by the Generator
STRIDE = (SEQ_LEN - PATCH_LEN) // (PATCH_NUM - 1)   # = 8, as in Model.forward

BC = B * C                       # 8 channel-series (exactly one f32 sublane tile)
LANE = 128                       # lane width for all kernel operands
PL_W = PATCH_NUM * PATCH_LEN     # 128  (flattened patch width)
PD_W = PATCH_NUM * D_MODEL       # 256  (flattened per-net hidden width)
HID2 = 2 * PD_W                  # 512  (season hidden | trend hidden)
BIAS_LANE = SEQ_LEN              # lane 72 of the padded input carries a constant 1.0


# ---------------------------------- Pallas kernel --------------------------------------
def _prnet_kernel(x_ref, w1_ref, wgen_ref, wskip_ref, out_ref):
    """Single straight-line body: both nets + season/trend/mean sum in 3 MXU dots."""
    x = x_ref[...]                                                        # [8, 128]
    # front end + input_layer + encoder projection for BOTH nets (biases folded via
    # the constant-1 carrier lane of x).
    h = jnp.dot(x, w1_ref[...], preferred_element_type=jnp.float32)      # [8, 512]
    # TODO(synk): torch.nn.GELU default is exact erf; tanh approximation used here.
    h = jax.nn.gelu(h, approximate=True)
    # stacked generators: produces season_out + trend_out directly (lane-dense, 128 wide)
    o = jnp.dot(h, wgen_ref[...], preferred_element_type=jnp.float32)    # [8, 128]
    # skip matrix: + mean(x, dim=1) broadcast over pred_len, + both generator biases
    o = o + jnp.dot(x, wskip_ref[...], preferred_element_type=jnp.float32)
    out_ref[...] = o                                                      # one wide store


def prnet_forward_kernel(x_pad, w1, wgen, wskip):
    vmem = pltpu.MemorySpace.VMEM
    return pl.pallas_call(
        _prnet_kernel,
        out_shape=jax.ShapeDtypeStruct((BC, LANE), jnp.float32),
        in_specs=[pl.BlockSpec(memory_space=vmem)] * 4,
        out_specs=pl.BlockSpec(memory_space=vmem),
    )(x_pad, w1, wgen, wskip)


# ------------------------- host-side (one-time) weight packing -------------------------
def init_net_params(key):
    k = jax.random.split(key, 6)
    return dict(
        w_in=jax.random.normal(k[0], (PATCH_NUM, PATCH_NUM), jnp.float32) / PATCH_NUM ** 0.5,
        b_in=jax.random.normal(k[1], (PATCH_NUM,), jnp.float32) * 0.01,
        w_enc=jax.random.normal(k[2], (PATCH_LEN, D_MODEL), jnp.float32) / PATCH_LEN ** 0.5,
        b_enc=jax.random.normal(k[3], (D_MODEL,), jnp.float32) * 0.01,
        w_gen=jax.random.normal(k[4], (PATCH_NUM, D_MODEL, PRED_LEN), jnp.float32)
             / ((PATCH_NUM * D_MODEL) ** 0.5),
        b_gen=jax.random.normal(k[5], (PRED_LEN,), jnp.float32) * 0.01,
    )


def _moving_average_matrix(length, kernel_size):
    """Matrix M with (s @ M) == replicate-padded moving average of s."""
    # TODO(synk): exact PRNet decomposition source not provided; standard moving average.
    def mov_avg(series):
        front = jnp.repeat(series[:1], (kernel_size - 1) // 2)
        end = jnp.repeat(series[-1:], kernel_size // 2)
        padded = jnp.concatenate([front, series, end])
        cs = jnp.concatenate([jnp.zeros((1,), series.dtype), jnp.cumsum(padded)])
        return (cs[kernel_size:] - cs[:-kernel_size]) / kernel_size
    return jax.vmap(mov_avg)(jnp.eye(length, dtype=jnp.float32))   # M[u, t] = f(e_u)[t]


def _segmentation_matrix():
    """Matrix G with (s @ G) == strided patches flattened patch-major [p*Lp + l]."""
    # TODO(synk): exact PRNet segmentation source not provided; strided patch gather.
    t_idx = (jnp.arange(PATCH_NUM)[:, None] * STRIDE +
             jnp.arange(PATCH_LEN)[None, :]).reshape(-1)            # [128]
    G = jnp.zeros((SEQ_LEN, PL_W), jnp.float32)
    return G.at[t_idx, jnp.arange(PL_W)].set(1.0)


def pack_model_params(season, trend):
    """Fold the whole linear pipeline into three lane-dense matmul operands."""
    eye_L = jnp.eye(SEQ_LEN, dtype=jnp.float32)
    center = eye_L - jnp.ones((SEQ_LEN, SEQ_LEN), jnp.float32) / SEQ_LEN   # mean-centering
    m_avg = _moving_average_matrix(SEQ_LEN, PATCH_LEN // 2)
    G = _segmentation_matrix()

    def front_w1(p, sel):
        # input_layer Linear(patch_num) along patch axis, patch-major flattening:
        A = jnp.kron(p["w_in"].T, jnp.eye(PATCH_LEN, dtype=jnp.float32))     # [128, 128]
        # TODO(synk): Encoder source not provided; per-patch Linear(16->32) + GELU used.
        Benc = jnp.kron(jnp.eye(PATCH_NUM, dtype=jnp.float32), p["w_enc"])   # [128, 256]
        F = center @ sel @ G @ A                                             # [72, 128]
        w1 = jnp.zeros((LANE, PD_W), jnp.float32)
        w1 = w1.at[:SEQ_LEN, :].set(F @ Benc)
        # biases (input_layer + encoder) ride the constant-1 carrier lane:
        b_pre = (jnp.repeat(p["b_in"], PATCH_LEN) @ Benc
                 + jnp.tile(p["b_enc"], PATCH_NUM))
        return w1.at[BIAS_LANE, :].set(b_pre)                                # [128, 256]

    w1 = jnp.concatenate([front_w1(season, eye_L - m_avg),                   # season: res
                          front_w1(trend, m_avg)], axis=1)                   # trend: avg
    # [128, 512]

    # TODO(synk): Generator source not provided; flatten(patch_num*d_model)->Linear used.
    wgen = jnp.zeros((HID2, LANE), jnp.float32)                              # [512, 128]
    wgen = wgen.at[:PD_W, :PRED_LEN].set(season["w_gen"].reshape(PD_W, PRED_LEN))
    wgen = wgen.at[PD_W:, :PRED_LEN].set(trend["w_gen"].reshape(PD_W, PRED_LEN))

    # skip matrix: Model-level `+ mean(x, dim=1)` plus both generator biases
    wskip = jnp.zeros((LANE, LANE), jnp.float32)                             # [128, 128]
    wskip = wskip.at[:SEQ_LEN, :PRED_LEN].set(1.0 / SEQ_LEN)
    wskip = wskip.at[BIAS_LANE, :PRED_LEN].set(season["b_gen"] + trend["b_gen"])

    return dict(w1=w1, wgen=wgen, wskip=wskip)


# ------------------------------------- forward -----------------------------------------
@jax.jit
def model_forward(x, packed):
    """x: [B, SEQ_LEN, C] -> [B, PRED_LEN, C]."""
    x_bc = jnp.transpose(x, (0, 2, 1)).reshape(BC, SEQ_LEN)      # per-channel series
    x_pad = jnp.zeros((BC, LANE), jnp.float32)
    x_pad = x_pad.at[:, :SEQ_LEN].set(x_bc)
    x_pad = x_pad.at[:, BIAS_LANE].set(1.0)                      # constant-1 bias carrier
    out = prnet_forward_kernel(x_pad, packed["w1"], packed["wgen"], packed["wskip"])
    out = out.reshape(B, C, LANE)[:, :, :PRED_LEN]               # drop lane padding
    return jnp.transpose(out, (0, 2, 1))                         # [B, PRED_LEN, C]


if __name__ == "__main__":
    key = jax.random.PRNGKey(0)
    kx, ks, kt = jax.random.split(key, 3)
    x = jax.random.normal(kx, (B, SEQ_LEN, C), jnp.float32)
    packed = pack_model_params(init_net_params(ks), init_net_params(kt))

    out = model_forward(x, packed)
    jax.block_until_ready(out)
    assert out.shape == (B, PRED_LEN, C), out.shape
    assert bool(jnp.all(jnp.isfinite(out)))
    print("KERNEL_OK")
</pallas_src>

<mosaic_0001>
module attributes {stable_mosaic.version = 11 : i64} {
  func.func @_prnet_kernel(%arg0: memref<8x128xf32, #tpu.memory_space<vmem>>, %arg1: memref<128x512xf32, #tpu.memory_space<vmem>>, %arg2: memref<512x128xf32, #tpu.memory_space<vmem>>, %arg3: memref<128x128xf32, #tpu.memory_space<vmem>>, %arg4: memref<8x128xf32, #tpu.memory_space<vmem>>) attributes {dimension_semantics = [], scalar_prefetch = 0 : i64, scratch_operands = 0 : i64, tpu.core_type = #tpu.core_type<tc>} {
    %c0 = arith.constant 0 : index
    %c0_0 = arith.constant 0 : index
    %0 = vector.load %arg0[%c0, %c0_0] : memref<8x128xf32, #tpu.memory_space<vmem>>, vector<8x128xf32>
    %c0_1 = arith.constant 0 : index
    %c0_2 = arith.constant 0 : index
    %1 = vector.load %arg1[%c0_1, %c0_2] : memref<128x512xf32, #tpu.memory_space<vmem>>, vector<128x512xf32>
    %cst = arith.constant dense<0.000000e+00> : vector<8x512xf32>
    %2 = tpu.matmul %0, %1, %cst {dimension_numbers = #tpu.dot_dimension_numbers<[1], [0], [0], [1], [0, 0, 1, 1], [], []>} : vector<8x128xf32>, vector<128x512xf32>, vector<8x512xf32> -> vector<8x512xf32>
    %3 = arith.mulf %2, %2 : vector<8x512xf32>
    %4 = arith.mulf %2, %3 : vector<8x512xf32>
    %cst_3 = arith.constant 4.471500e-02 : f32
    %5 = vector.broadcast %cst_3 : f32 to vector<8x512xf32>
    %6 = arith.mulf %5, %4 : vector<8x512xf32>
    %7 = arith.addf %2, %6 : vector<8x512xf32>
    %cst_4 = arith.constant 0.797884583 : f32
    %8 = vector.broadcast %cst_4 : f32 to vector<8x512xf32>
    %9 = arith.mulf %8, %7 : vector<8x512xf32>
    %10 = math.tanh %9 : vector<8x512xf32>
    %cst_5 = arith.constant 1.000000e+00 : f32
    %11 = vector.broadcast %cst_5 : f32 to vector<8x512xf32>
    %12 = arith.addf %11, %10 : vector<8x512xf32>
    %cst_6 = arith.constant 5.000000e-01 : f32
    %13 = vector.broadcast %cst_6 : f32 to vector<8x512xf32>
    %14 = arith.mulf %13, %12 : vector<8x512xf32>
    %15 = arith.mulf %2, %14 : vector<8x512xf32>
    %c0_7 = arith.constant 0 : index
    %c0_8 = arith.constant 0 : index
    %16 = vector.load %arg2[%c0_7, %c0_8] : memref<512x128xf32, #tpu.memory_space<vmem>>, vector<512x128xf32>
    %cst_9 = arith.constant dense<0.000000e+00> : vector<8x128xf32>
    %17 = tpu.matmul %15, %16, %cst_9 {dimension_numbers = #tpu.dot_dimension_numbers<[1], [0], [0], [1], [0, 0, 1, 1], [], []>} : vector<8x512xf32>, vector<512x128xf32>, vector<8x128xf32> -> vector<8x128xf32>
    %c0_10 = arith.constant 0 : index
    %c0_11 = arith.constant 0 : index
    %18 = vector.load %arg3[%c0_10, %c0_11] : memref<128x128xf32, #tpu.memory_space<vmem>>, vector<128x128xf32>
    %cst_12 = arith.constant dense<0.000000e+00> : vector<8x128xf32>
    %19 = tpu.matmul %0, %18, %cst_12 {dimension_numbers = #tpu.dot_dimension_numbers<[1], [0], [0], [1], [0, 0, 1, 1], [], []>} : vector<8x128xf32>, vector<128x128xf32>, vector<8x128xf32> -> vector<8x128xf32>
    %20 = arith.addf %17, %19 : vector<8x128xf32>
    %c0_13 = arith.constant 0 : index
    %c0_14 = arith.constant 0 : index
    %21 = vector.load %arg4[%c0_13, %c0_14] : memref<8x128xf32, #tpu.memory_space<vmem>>, vector<8x128xf32>
    tpu.vector_store %arg4[%c0_13, %c0_14], %20 {strides = array<i32>} : memref<8x128xf32, #tpu.memory_space<vmem>>, vector<8x128xf32>,
    return
  }
}

</mosaic_0001>

<bundles_post_ra>
// kernel: model_forward.1
= control target key start
LH: loop header
LB: loop body
LE: loop exit
PB: predicated region body
PF: predicated region fallthrough
CT: control target
= control target key end

     0   :  { %9 = vsyncpa [#allocation3], 0  ;;  %s1046_s0 = inlined_call_operand.vmem [shape: f32[8,128], index: 0, kind: input, shape index: {}]   ;;  %s1047_s1 = inlined_call_operand.hbm [shape: f32[128,512], index: 1, kind: input, shape index: {}]   ;;  %s1048_s2 = inlined_call_operand.hbm [shape: f32[512,128], index: 2, kind: input, shape index: {}]   ;;  %s1049_s3 = inlined_call_operand.hbm [shape: f32[128,128], index: 3, kind: input, shape index: {}]   ;;  %s1050_s4 = inlined_call_operand.vmem [shape: f32[8,128], index: 4, kind: output, shape index: {}]  }
   0x1   :  { %10 = vsyncpa [#allocation5], 0  ;;  %s960_s15 = smov [#allocation4]   ;;  %s890_s19 = scalar_lea.hbm %s1048_s2, 8192 }
   0x2   :  { %s30_s16 = sshll.u32 %s960_s15, 4  ;;  %p891_p0 = scmp.ne.s32.totalorder %s1048_s2, %s890_s19  ;;  %s31_s16 = int_to_ptr.vmem [resolvable:$true] %s30_s16 }
   0x3   :  { %p894_p1 = scmp.lt.u32.totalorder %s890_s19, %s1048_s2 }
   0x5   :  { %p896_p2 = pnand %p894_p1, %p891_p0 }
   0x7   :  { %899 = shalt.err (!%p896_p2)
}
   0x8   :  { %s900_s24 = scalar_lea.vmem %s31_s16, 8192  ;;  %p905_p4 = scmp.lt.s32.totalorder %s31_s16, %s31_s16 }
   0x9   :  { %p901_p3 = scmp.ne.s32.totalorder %s31_s16, %s900_s24  ;;  %p906_p5 = scmp.lt.s32.totalorder %s900_s24, %s900_s24 }
   0xb   :  { %p907_p6 = por %p906_p5, %p905_p4 }
   0xd   :  { %p908_p7 = pnand %p907_p6, %p901_p3 }
   0xf   :  { %911 = shalt.err (!%p908_p7)
}
  0x10   :  { %s961_s25 = smov 128   ;;  %s962_s26 = smov 8  }
  0x11   :  { %36 = dma.hbm_to_vmem [thread:$0]  %s1048_s2, 8192, %s31_s16, [#allocation5], %s961_s25, %s961_s25, %s962_s26  }
  0x12   :  { %s963_s29 = smov [#allocation2]   ;;  %s912_s7 = scalar_lea.hbm %s1047_s1, 8192 }
  0x13   :  { %s18_s30 = sshll.u32 %s963_s29, 4  ;;  %p913_p8 = scmp.ne.s32.totalorder %s1047_s1, %s912_s7  ;;  %s19_s30 = int_to_ptr.vmem [resolvable:$true] %s18_s30 }
  0x14   :  { %p916_p9 = scmp.lt.u32.totalorder %s912_s7, %s1047_s1 }
  0x16   :  { %p918_p10 = pnand %p916_p9, %p913_p8 }
  0x18   :  { %921 = shalt.err (!%p918_p10)
}
  0x19   :  { %s922_s12 = scalar_lea.vmem %s19_s30, 8192  ;;  %p927_p12 = scmp.lt.s32.totalorder %s19_s30, %s19_s30 }
  0x1a   :  { %p923_p11 = scmp.ne.s32.totalorder %s19_s30, %s922_s12  ;;  %p928_p13 = scmp.lt.s32.totalorder %s922_s12, %s922_s12 }
  0x1c   :  { %p929_p0 = por %p928_p13, %p927_p12 }
  0x1e   :  { %p930_p1 = pnand %p929_p0, %p923_p11 }
  0x20   :  { %933 = shalt.err (!%p930_p1)
}
  0x21   :  { %s964_s2 = smov 512   ;;  %s965_s13 = smov 32  }
  0x22   :  { %24 = dma.hbm_to_vmem [thread:$0]  %s1047_s1, 8192, %s19_s30, [#allocation3], %s964_s2, %s964_s2, %s965_s13  }
  0x23   :  { %s966_s16 = smov [#allocation6]   ;;  %s934_s20 = scalar_lea.hbm %s1049_s3, 2048 }
  0x24   :  { %s42_s17 = sshll.u32 %s966_s16, 4  ;;  %p935_p2 = scmp.ne.s32.totalorder %s1049_s3, %s934_s20  ;;  %s43_s17 = int_to_ptr.vmem [resolvable:$true] %s42_s17 }
  0x25   :  { %p938_p3 = scmp.lt.u32.totalorder %s934_s20, %s1049_s3 }
  0x27   :  { %p940_p4 = pnand %p938_p3, %p935_p2 }
  0x29   :  { %943 = shalt.err (!%p940_p4)
}
  0x2a   :  { %s944_s27 = scalar_lea.vmem %s43_s17, 2048  ;;  %p949_p6 = scmp.lt.s32.totalorder %s43_s17, %s43_s17 }
  0x2b   :  { %p945_p5 = scmp.ne.s32.totalorder %s43_s17, %s944_s27  ;;  %p950_p7 = scmp.lt.s32.totalorder %s944_s27, %s944_s27 }
  0x2d   :  { %p951_p8 = por %p950_p7, %p949_p6 }
  0x2f   :  { %p952_p9 = pnand %p951_p8, %p945_p5 }
  0x31   :  { %955 = shalt.err (!%p952_p9)
}
  0x32   :  { %48 = dma.hbm_to_vmem [thread:$0]  %s1049_s3, 2048, %s43_s17, [#allocation5], %s961_s25, %s961_s25, %s962_s26  }
  0x33   :  { %956 = dma.done.wait [#allocation3], 8192  }
  0x34   :  { %957 = vsyncadd [#allocation3], 4294959104 }
  0x35   :  { %958 = dma.done.wait [#allocation5], 10240  }
  0x36   :  { %959 = vsyncadd [#allocation5], 4294957056  ;;  %v967_v0 = vmov 0.0   ;;  %v60_v1 = vld [vmem:[#allocation2 + $0x8] sm:$0xff]  ;;  %v62_v3 = vld [vmem:[#allocation2 + $0x18] sm:$0xff]  ;;  %vm969_vm0 = vmmov 0  }
  0x37   :  { %187 = vmatprep.mubr.f32.mxu0 %v967_v0  ;;  %258 = vmatprep.mubr.f32.mxu1 %v967_v0  ;;  %v64_v2 = vld [vmem:[#allocation2 + $0x28] sm:$0xff]  ;;  %v66_v5 = vld [vmem:[#allocation2 + $0x38] sm:$0xff]  ;;  %v59_v6 = vld [vmem:[#allocation2] sm:$0xff] }
  0x38   :  { %v720_v4 = vpack.c.bf16 %v64_v2, %v60_v1  ;;  %v63_v7 = vld [vmem:[#allocation2 + $0x20] sm:$0xff]  ;;  %v752_v8 = vpack.c.bf16 %v66_v5, %v62_v3  ;;  %v61_v10 = vld [vmem:[#allocation2 + $0x10] sm:$0xff]  ;;  %v68_v12 = vld [vmem:[#allocation2 + $0x48] sm:$0xff] }
  0x39   :  { %v722_v9 = vpack.c.bf16 %v63_v7, %v59_v6  ;;  %v65_v11 = vld [vmem:[#allocation2 + $0x30] sm:$0xff]  ;;  %v72_v14 = vld [vmem:[#allocation2 + $0x68] sm:$0xff]  ;;  %v70_v15 = vld [vmem:[#allocation2 + $0x58] sm:$0xff] }
  0x3a   :  { %721 = vmatprep.subr.bf16.mxu0 %v720_v4  ;;  %v754_v13 = vpack.c.bf16 %v65_v11, %v61_v10  ;;  %v74_v16 = vld [vmem:[#allocation2 + $0x78] sm:$0xff]  ;;  %753 = vmatprep.subr.bf16.mxu1 %v752_v8  ;;  %v724_v17 = vpack.c.bf16 %v72_v14, %v68_v12  ;;  %v67_v19 = vld [vmem:[#allocation2 + $0x40] sm:$0xff]  ;;  %v69_v21 = vld [vmem:[#allocation2 + $0x50] sm:$0xff] }
  0x3b   :  { %723 = vmatpush1.bf16.msra.mxu0 %v722_v9  ;;  %v756_v18 = vpack.c.bf16 %v74_v16, %v70_v15  ;;  %v71_v20 = vld [vmem:[#allocation2 + $0x60] sm:$0xff]  ;;  %v73_v23 = vld [vmem:[#allocation2 + $0x70] sm:$0xff]  ;;  %v76_v24 = vld [vmem:[#allocation2 + $0x88] sm:$0xff] }
  0x3c   :  { %755 = vmatpush1.bf16.msra.mxu1 %v754_v13  ;;  %v726_v22 = vpack.c.bf16 %v71_v20, %v67_v19  ;;  %v80_v25 = vld [vmem:[#allocation2 + $0xa8] sm:$0xff]  ;;  %725 = vmatprep.subr.bf16.mxu0 %v724_v17  ;;  %v758_v26 = vpack.c.bf16 %v73_v23, %v69_v21  ;;  %v78_v28 = vld [vmem:[#allocation2 + $0x98] sm:$0xff]  ;;  %v75_v30 = vld [vmem:[#allocation2 + $0x80] sm:$0xff] }
  0x3d   :  { %757 = vmatprep.subr.bf16.mxu1 %v756_v18  ;;  %v728_v27 = vpack.c.bf16 %v80_v25, %v76_v24  ;;  %v82_v29 = vld [vmem:[#allocation2 + $0xb8] sm:$0xff]  ;;  %v79_v32 = vld [vmem:[#allocation2 + $0xa0] sm:$0xff]  ;;  %v77_v33 = vld [vmem:[#allocation2 + $0x90] sm:$0xff] }
  0x3e   :  { %v760_v31 = vpack.c.bf16 %v82_v29, %v78_v28  ;;  %v81_v34 = vld [vmem:[#allocation2 + $0xb0] sm:$0xff]  ;;  %v730_v35 = vpack.c.bf16 %v79_v32, %v75_v30  ;;  %v84_v36 = vld [vmem:[#allocation2 + $0xc8] sm:$0xff]  ;;  %v86_v38 = vld [vmem:[#allocation2 + $0xd8] sm:$0xff] }
  0x3f   :  { %727 = vmatpush1.bf16.msra.mxu0 %v726_v22  ;;  %v88_v37 = vld [vmem:[#allocation2 + $0xe8] sm:$0xff]  ;;  %v762_v39 = vpack.c.bf16 %v81_v34, %v77_v33  ;;  %v90_v41 = vld [vmem:[#allocation2 + $0xf8] sm:$0xff]  ;;  %v83_v42 = vld [vmem:[#allocation2 + $0xc0] sm:$0xff] }
  0x40   :  { %759 = vmatpush1.bf16.msra.mxu1 %v758_v26  ;;  %729 = vmatprep.subr.bf16.mxu0 %v728_v27  ;;  %v732_v40 = vpack.c.bf16 %v88_v37, %v84_v36  ;;  %v87_v43 = vld [vmem:[#allocation2 + $0xe0] sm:$0xff]  ;;  %v764_v44 = vpack.c.bf16 %v90_v41, %v86_v38  ;;  %v85_v45 = vld [vmem:[#allocation2 + $0xd0] sm:$0xff]  ;;  %v92_v47 = vld [vmem:[#allocation2 + $0x108] sm:$0xff] }
  0x41   :  { %761 = vmatprep.subr.bf16.mxu1 %v760_v31  ;;  %v89_v46 = vld [vmem:[#allocation2 + $0xf0] sm:$0xff]  ;;  %v96_v48 = vld [vmem:[#allocation2 + $0x128] sm:$0xff]  ;;  %v94_v49 = vld [vmem:[#allocation2 + $0x118] sm:$0xff]  ;;  %v734_v51 = vpack.c.bf16 %v87_v43, %v83_v42  ;;  %v968_v43 = vmov 0.0|0.0  }
  0x42   :  { %v98_v50 = vld [vmem:[#allocation2 + $0x138] sm:$0xff]  ;;  %v766_v52 = vpack.c.bf16 %v89_v46, %v85_v45  ;;  %v736_v53 = vpack.c.bf16 %v96_v48, %v92_v47  ;;  %v91_v54 = vld [vmem:[#allocation2 + $0x100] sm:$0xff]  ;;  %v93_v56 = vld [vmem:[#allocation2 + $0x110] sm:$0xff] }
  0x43   :  { %731 = vmatpush1.bf16.msra.mxu0 %v730_v35  ;;  %v95_v55 = vld [vmem:[#allocation2 + $0x120] sm:$0xff]  ;;  %v768_v57 = vpack.c.bf16 %v98_v50, %v94_v49  ;;  %v97_v58 = vld [vmem:[#allocation2 + $0x130] sm:$0xff]  ;;  %v100_v59 = vld [vmem:[#allocation2 + $0x148] sm:$0xff] }
  0x44   :  { %763 = vmatpush1.bf16.msra.mxu1 %v762_v39  ;;  %733 = vmatprep.subr.bf16.mxu0 %v732_v40  ;;  %v104_v60 = vld [vmem:[#allocation2 + $0x168] sm:$0xff]  ;;  %v102_v61 = vld [vmem:[#allocation2 + $0x158] sm:$0xff]  ;;  %v738_v63 = vpack.c.bf16 %v95_v55, %v91_v54  ;;  %v770_v1 = vpack.c.bf16 %v97_v58, %v93_v56  ;;  %v99_v3 = vld [vmem:[#allocation2 + $0x140] sm:$0xff] }
  0x45   :  { %765 = vmatprep.subr.bf16.mxu1 %v764_v44  ;;  %v106_v62 = vld [vmem:[#allocation2 + $0x178] sm:$0xff]  ;;  %v740_v2 = vpack.c.bf16 %v104_v60, %v100_v59  ;;  %v103_v4 = vld [vmem:[#allocation2 + $0x160] sm:$0xff]  ;;  %v101_v5 = vld [vmem:[#allocation2 + $0x150] sm:$0xff] }
  0x46   :  { %v772_v6 = vpack.c.bf16 %v106_v62, %v102_v61  ;;  %v105_v7 = vld [vmem:[#allocation2 + $0x170] sm:$0xff]  ;;  %v108_v8 = vld [vmem:[#allocation2 + $0x188] sm:$0xff]  ;;  %v110_v10 = vld [vmem:[#allocation2 + $0x198] sm:$0xff]  ;;  %v742_v12 = vpack.c.bf16 %v103_v4, %v99_v3 }
  0x47   :  { %735 = vmatpush1.bf16.msra.mxu0 %v734_v51  ;;  %v112_v9 = vld [vmem:[#allocation2 + $0x1a8] sm:$0xff]  ;;  %v114_v11 = vld [vmem:[#allocation2 + $0x1b8] sm:$0xff]  ;;  %v774_v13 = vpack.c.bf16 %v105_v7, %v101_v5  ;;  %v107_v15 = vld [vmem:[#allocation2 + $0x180] sm:$0xff] }
  0x48   :  { %767 = vmatpush1.bf16.msra.mxu1 %v766_v52  ;;  %737 = vmatprep.subr.bf16.mxu0 %v736_v53  ;;  %v744_v14 = vpack.c.bf16 %v112_v9, %v108_v8  ;;  %v111_v16 = vld [vmem:[#allocation2 + $0x1a0] sm:$0xff]  ;;  %v109_v17 = vld [vmem:[#allocation2 + $0x190] sm:$0xff]  ;;  %v776_v18 = vpack.c.bf16 %v114_v11, %v110_v10  ;;  %v116_v20 = vld [vmem:[#allocation2 + $0x1c8] sm:$0xff] }
  0x49   :  { %769 = vmatprep.subr.bf16.mxu1 %v768_v57  ;;  %v113_v19 = vld [vmem:[#allocation2 + $0x1b0] sm:$0xff]  ;;  %v120_v21 = vld [vmem:[#allocation2 + $0x1e8] sm:$0xff]  ;;  %v118_v22 = vld [vmem:[#allocation2 + $0x1d8] sm:$0xff]  ;;  %v746_v24 = vpack.c.bf16 %v111_v16, %v107_v15 }
  0x4a   :  { %v122_v23 = vld [vmem:[#allocation2 + $0x1f8] sm:$0xff]  ;;  %v778_v25 = vpack.c.bf16 %v113_v19, %v109_v17  ;;  %v748_v26 = vpack.c.bf16 %v120_v21, %v116_v20  ;;  %v115_v27 = vld [vmem:[#allocation2 + $0x1c0] sm:$0xff]  ;;  %v117_v30 = vld [vmem:[#allocation2 + $0x1d0] sm:$0xff] }
  0x4b   :  { %739 = vmatpush1.bf16.msra.mxu0 %v738_v63  ;;  %v119_v28 = vld [vmem:[#allocation2 + $0x1e0] sm:$0xff]  ;;  %v780_v29 = vpack.c.bf16 %v122_v23, %v118_v22  ;;  %v121_v31 = vld [vmem:[#allocation2 + $0x1f0] sm:$0xff]  ;;  %v318_v33 = vld [vmem:[#allocation4 + $0x88] sm:$0xff] }
  0x4c   :  { %771 = vmatpush1.bf16.msra.mxu1 %v770_v1  ;;  %741 = vmatprep.subr.bf16.mxu0 %v740_v2  ;;  %v317_v32 = vld [vmem:[#allocation4 + $0x80] sm:$0xff]  ;;  %v750_v34 = vpack.c.bf16 %v119_v28, %v115_v27  ;;  %v782_v35 = vpack.c.bf16 %v121_v31, %v117_v30  ;;  %v366_v37 = vld [vmem:[#allocation6 + $0x8] sm:$0xff]  ;;  %v367_v44 = vld [vmem:[#allocation6 + $0x10] sm:$0xff] }
  0x4d   :  { %773 = vmatprep.subr.bf16.mxu1 %v772_v6  ;;  %v365_v36 = vld [vmem:[#allocation6] sm:$0xff]  ;;  %v808_v38 = vpack.c.bf16 %v318_v33, %v317_v32  ;;  %v302_v40 = vld [vmem:[#allocation4 + $0x8] sm:$0xff]  ;;  %v368_v45 = vld [vmem:[#allocation6 + $0x18] sm:$0xff] }
  0x4e   :  { %v301_v39 = vld [vmem:[#allocation4] sm:$0xff]  ;;  %v785_v42 = vpack.c.bf16 %v366_v37, %v365_v36  ;;  %v788_v47 = vpack.c.bf16 %v368_v45, %v367_v44  ;;  %v370_v49 = vld [vmem:[#allocation6 + $0x28] sm:$0xff]  ;;  %v371_v51 = vld [vmem:[#allocation6 + $0x30] sm:$0xff] }
  0x4f   :  { %743 = vmatpush1.bf16.msra.mxu0 %v742_v12  ;;  %v58_v41 = vld [vmem:[%s1046_s0] sm:$0xff]  ;;  %v810_v46 = vpack.c.bf16 %v302_v40, %v301_v39  ;;  %v372_v52 = vld [vmem:[#allocation6 + $0x38] sm:$0xff]  ;;  %v374_v55 = vld [vmem:[#allocation6 + $0x48] sm:$0xff] }
  0x50   :  { %775 = vmatpush1.bf16.msra.mxu1 %v774_v13  ;;  %745 = vmatprep.subr.bf16.mxu0 %v744_v14  ;;  %v369_v48 = vld [vmem:[#allocation6 + $0x20] sm:$0xff]  ;;  %v794_v53 = vpack.c.bf16 %v372_v52, %v371_v51  ;;  %v375_v57 = vld [vmem:[#allocation6 + $0x50] sm:$0xff]  ;;  %v376_v58 = vld [vmem:[#allocation6 + $0x58] sm:$0xff] }
  0x51   :  { %777 = vmatprep.subr.bf16.mxu1 %v776_v18  ;;  %v791_v50 = vpack.c.bf16 %v370_v49, %v369_v48  ;;  %v373_v54 = vld [vmem:[#allocation6 + $0x40] sm:$0xff]  ;;  %v800_v59 = vpack.c.bf16 %v376_v58, %v375_v57  ;;  %v378_v60 = vld [vmem:[#allocation6 + $0x68] sm:$0xff]  ;;  %v379_v62 = vld [vmem:[#allocation6 + $0x70] sm:$0xff] }
  0x52   :  { %v797_v56 = vpack.c.bf16 %v374_v55, %v373_v54  ;;  %v380_v63 = vld [vmem:[#allocation6 + $0x78] sm:$0xff]  ;;  %v349_v1 = vld [vmem:[#allocation4 + $0x180] sm:$0xff]  ;;  %v350_v2 = vld [vmem:[#allocation4 + $0x188] sm:$0xff] }
  0x53   :  { %747 = vmatpush1.bf16.msra.mxu0 %v746_v24  ;;  %v806_v3 = vpack.c.bf16 %v380_v63, %v379_v62  ;;  %v840_v4 = vpack.c.bf16 %v350_v2, %v349_v1  ;;  %v333_v5 = vld [vmem:[#allocation4 + $0x100] sm:$0xff]  ;;  %v334_v6 = vld [vmem:[#allocation4 + $0x108] sm:$0xff]  ;;  %v319_v8 = vld [vmem:[#allocation4 + $0x90] sm:$0xff] }
  0x54   :  { %779 = vmatpush1.bf16.msra.mxu1 %v778_v25  ;;  %749 = vmatprep.subr.bf16.mxu0 %v748_v26  ;;  %v842_v7 = vpack.c.bf16 %v334_v6, %v333_v5  ;;  %v320_v9 = vld [vmem:[#allocation4 + $0x98] sm:$0xff]  ;;  %v351_v10 = vld [vmem:[#allocation4 + $0x190] sm:$0xff]  ;;  %v321_v20 = vld [vmem:[#allocation4 + $0xa0] sm:$0xff] }
  0x55   :  { %781 = vmatprep.subr.bf16.mxu1 %v780_v29  ;;  %v812_v11 = vpack.c.bf16 %v320_v9, %v319_v8  ;;  %v352_v12 = vld [vmem:[#allocation4 + $0x198] sm:$0xff]  ;;  %v303_v13 = vld [vmem:[#allocation4 + $0x10] sm:$0xff]  ;;  %v322_v21 = vld [vmem:[#allocation4 + $0xa8] sm:$0xff] }
  0x56   :  { %v304_v14 = vld [vmem:[#allocation4 + $0x18] sm:$0xff]  ;;  %v844_v15 = vpack.c.bf16 %v352_v12, %v351_v10  ;;  %v335_v17 = vld [vmem:[#allocation4 + $0x110] sm:$0xff]  ;;  %v353_v22 = vld [vmem:[#allocation4 + $0x1a0] sm:$0xff]  ;;  %v816_v23 = vpack.c.bf16 %v322_v21, %v321_v20 }
  0x57   :  { %751 = vmatpush1.bf16.msra.mxu0 %v750_v34  ;;  %v814_v16 = vpack.c.bf16 %v304_v14, %v303_v13  ;;  %v336_v18 = vld [vmem:[#allocation4 + $0x118] sm:$0xff]  ;;  %v354_v24 = vld [vmem:[#allocation4 + $0x1a8] sm:$0xff]  ;;  %v305_v25 = vld [vmem:[#allocation4 + $0x20] sm:$0xff] }
  0x58   :  { %783 = vmatpush1.bf16.msra.mxu1 %v782_v35  ;;  %784 = vmatprep.subr.bf16.mxu0 %v968_v43  ;;  %v846_v19 = vpack.c.bf16 %v336_v18, %v335_v17  ;;  %v306_v26 = vld [vmem:[#allocation4 + $0x28] sm:$0xff]  ;;  %v848_v27 = vpack.c.bf16 %v354_v24, %v353_v22  ;;  %v337_v29 = vld [vmem:[#allocation4 + $0x120] sm:$0xff]  ;;  %v323_v32 = vld [vmem:[#allocation4 + $0xb0] sm:$0xff] }
  0x59   :  { %809 = vmatprep.subr.bf16.mxu1 %v808_v38  ;;  %v818_v28 = vpack.c.bf16 %v306_v26, %v305_v25  ;;  %v338_v30 = vld [vmem:[#allocation4 + $0x128] sm:$0xff]  ;;  %v324_v33 = vld [vmem:[#allocation4 + $0xb8] sm:$0xff]  ;;  %v355_v34 = vld [vmem:[#allocation4 + $0x1b0] sm:$0xff] }
  0x5a   :  { %188 = vmatmul.mubr.f32.vlgmr.msra.gmra.mrb[0].mxu0 %v58_v41  ;;  %v850_v31 = vpack.c.bf16 %v338_v30, %v337_v29  ;;  %v820_v35 = vpack.c.bf16 %v324_v33, %v323_v32  ;;  %v356_v36 = vld [vmem:[#allocation4 + $0x1b8] sm:$0xff]  ;;  %v307_v37 = vld [vmem:[#allocation4 + $0x30] sm:$0xff]  ;;  %v325_v44 = vld [vmem:[#allocation4 + $0xc0] sm:$0xff] }
  0x5b   :  { %259 = vmatmul.mubr.f32.vlgmr.msra.gmra.mrb[0].mxu1 %v58_v41  ;;  %786 = vmatpush3.bf16.msra.mxu0 %v785_v42  ;;  %v308_v38 = vld [vmem:[#allocation4 + $0x38] sm:$0xff]  ;;  %v852_v39 = vpack.c.bf16 %v356_v36, %v355_v34  ;;  %v326_v45 = vld [vmem:[#allocation4 + $0xc8] sm:$0xff]  ;;  %v309_v49 = vld [vmem:[#allocation4 + $0x40] sm:$0xff] }
  0x5c   :  { %787 = vmatprep.subr.bf16.mxu0 %v968_v43  ;;  %717 = vmatprep.mubr.msk.f32.mxu0 %vm969_vm0, %v967_v0  ;;  %v377_v0 = vld [vmem:[#allocation6 + $0x60] sm:$0xff]  ;;  %v822_v40 = vpack.c.bf16 %v308_v38, %v307_v37  ;;  %v340_v42 = vld [vmem:[#allocation4 + $0x138] sm:$0xff]  ;;  %v358_v48 = vld [vmem:[#allocation4 + $0x1c8] sm:$0xff] }
  0x5d   :  { %811 = vmatpush3.bf16.msra.mxu1 %v810_v46  ;;  %v803_v61 = vpack.c.bf16 %v378_v60, %v377_v0  ;;  %v357_v46 = vld [vmem:[#allocation4 + $0x1c0] sm:$0xff]  ;;  %v342_v54 = vld [vmem:[#allocation4 + $0x148] sm:$0xff]  ;;  %v328_v57 = vld [vmem:[#allocation4 + $0xd8] sm:$0xff] }
  0x5e   :  { %813 = vmatprep.subr.bf16.mxu1 %v812_v11  ;;  %v856_v51 = vpack.c.bf16 %v358_v48, %v357_v46  ;;  %v359_v58 = vld [vmem:[#allocation4 + $0x1d0] sm:$0xff]  ;;  %v360_v0 = vld [vmem:[#allocation4 + $0x1d8] sm:$0xff]  ;;  %v330_v5 = vld [vmem:[#allocation4 + $0xe8] sm:$0xff] }
  0x5f   :  { %789 = vmatpush3.bf16.msra.mxu0 %v788_v47  ;;  %v824_v47 = vpack.c.bf16 %v326_v45, %v325_v44  ;;  %v311_v60 = vld [vmem:[#allocation4 + $0x50] sm:$0xff]  ;;  %v860_v62 = vpack.c.bf16 %v360_v0, %v359_v58  ;;  %v344_v2 = vld [vmem:[#allocation4 + $0x158] sm:$0xff]  ;;  %v361_v6 = vld [vmem:[#allocation4 + $0x1e0] sm:$0xff] }
  0x60   :  { %790 = vmatprep.subr.bf16.mxu0 %v968_v43  ;;  %v343_v1 = vld [vmem:[#allocation4 + $0x150] sm:$0xff]  ;;  %v362_v8 = vld [vmem:[#allocation4 + $0x1e8] sm:$0xff]  ;;  %v313_v9 = vld [vmem:[#allocation4 + $0x60] sm:$0xff] }
  0x61   :  { %815 = vmatpush3.bf16.msra.mxu1 %v814_v16  ;;  %v314_v10 = vld [vmem:[#allocation4 + $0x68] sm:$0xff]  ;;  %v864_v11 = vpack.c.bf16 %v362_v8, %v361_v6  ;;  %v345_v13 = vld [vmem:[#allocation4 + $0x160] sm:$0xff]  ;;  %v331_v16 = vld [vmem:[#allocation4 + $0xf0] sm:$0xff] }
  0x62   :  { %817 = vmatprep.subr.bf16.mxu1 %v816_v23  ;;  %v834_v12 = vpack.c.bf16 %v314_v10, %v313_v9  ;;  %v346_v14 = vld [vmem:[#allocation4 + $0x168] sm:$0xff]  ;;  %v332_v17 = vld [vmem:[#allocation4 + $0xf8] sm:$0xff]  ;;  %v363_v18 = vld [vmem:[#allocation4 + $0x1f0] sm:$0xff] }
  0x63   :  { %792 = vmatpush3.bf16.msra.mxu0 %v791_v50  ;;  %v310_v50 = vld [vmem:[#allocation4 + $0x48] sm:$0xff]  ;;  %v364_v20 = vld [vmem:[#allocation4 + $0x1f8] sm:$0xff]  ;;  %v315_v21 = vld [vmem:[#allocation4 + $0x70] sm:$0xff] }
  0x64   :  { %793 = vmatprep.subr.bf16.mxu0 %v968_v43  ;;  %v826_v52 = vpack.c.bf16 %v310_v50, %v309_v49  ;;  %v316_v22 = vld [vmem:[#allocation4 + $0x78] sm:$0xff]  ;;  %v868_v23 = vpack.c.bf16 %v364_v20, %v363_v18  ;;  %v347_v25 = vld [vmem:[#allocation4 + $0x170] sm:$0xff] }
  0x65   :  { %819 = vmatpush3.bf16.msra.mxu1 %v818_v28  ;;  %v838_v24 = vpack.c.bf16 %v316_v22, %v315_v21  ;;  %v348_v26 = vld [vmem:[#allocation4 + $0x178] sm:$0xff] }
  0x66   :  { %821 = vmatprep.subr.bf16.mxu1 %v820_v35 }
  0x67   :  { %795 = vmatpush3.bf16.msra.mxu0 %v794_v53  ;;  %v341_v53 = vld [vmem:[#allocation4 + $0x140] sm:$0xff] }
  0x68   :  { %796 = vmatprep.subr.bf16.mxu0 %v968_v43  ;;  %v858_v55 = vpack.c.bf16 %v342_v54, %v341_v53 }
  0x69   :  { %823 = vmatpush3.bf16.msra.mxu1 %v822_v40 }
  0x6a   :  { %825 = vmatprep.subr.bf16.mxu1 %v824_v47 }
  0x6b   :  { %798 = vmatpush3.bf16.msra.mxu0 %v797_v56  ;;  %v327_v56 = vld [vmem:[#allocation4 + $0xd0] sm:$0xff] }
  0x6c   :  { %799 = vmatprep.subr.bf16.mxu0 %v968_v43 }
  0x6d   :  { %827 = vmatpush3.bf16.msra.mxu1 %v826_v52 }
  0x6f   :  { %801 = vmatpush3.bf16.msra.mxu0 %v800_v59  ;;  %v828_v59 = vpack.c.bf16 %v328_v57, %v327_v56 }
  0x70   :  { %802 = vmatprep.subr.bf16.mxu0 %v968_v43 }
  0x71   :  { %829 = vmatprep.subr.bf16.mxu1 %v828_v59 }
  0x73   :  { %804 = vmatpush3.bf16.msra.mxu0 %v803_v61  ;;  %v312_v61 = vld [vmem:[#allocation4 + $0x58] sm:$0xff] }
  0x74   :  { %805 = vmatprep.subr.bf16.mxu0 %v968_v43  ;;  %v830_v63 = vpack.c.bf16 %v312_v61, %v311_v60 }
  0x76   :  { %831 = vmatpush3.bf16.msra.mxu1 %v830_v63 }
  0x77   :  { %807 = vmatpush3.bf16.msra.mxu0 %v806_v3  ;;  %v862_v3 = vpack.c.bf16 %v344_v2, %v343_v1 }
  0x78   :  { %841 = vmatprep.subr.bf16.mxu0 %v840_v4  ;;  %v329_v4 = vld [vmem:[#allocation4 + $0xe0] sm:$0xff] }
  0x7a   :  { %718 = vmatmul.mubr.f32.vlgmr.msra.gmra.mrb[2].mxu0 %v58_v41  ;;  %v339_v41 = vld [vmem:[#allocation4 + $0x130] sm:$0xff] }
  0x7b   :  { %843 = vmatpush3.bf16.msra.mxu0 %v842_v7  ;;  %v854_v43 = vpack.c.bf16 %v340_v42, %v339_v41  ;;  %v832_v7 = vpack.c.bf16 %v330_v5, %v329_v4 }
  0x7c   :  { %845 = vmatprep.subr.bf16.mxu0 %v844_v15  ;;  %v866_v15 = vpack.c.bf16 %v346_v14, %v345_v13 }
  0x7d   :  { %833 = vmatprep.subr.bf16.mxu1 %v832_v7 }
  0x7e   :  { %835 = vmatpush3.bf16.msra.mxu1 %v834_v12 }
  0x7f   :  { %847 = vmatpush3.bf16.msra.mxu0 %v846_v19  ;;  %v836_v19 = vpack.c.bf16 %v332_v17, %v331_v16 }
  0x80   :  { %849 = vmatprep.subr.bf16.mxu0 %v848_v27  ;;  %v870_v27 = vpack.c.bf16 %v348_v26, %v347_v25 }
  0x81   :  { %837 = vmatprep.subr.bf16.mxu1 %v836_v19 }
  0x82   :  { %839 = vmatpush3.bf16.msra.mxu1 %v838_v24 }
  0x83   :  { %851 = vmatpush3.bf16.msra.mxu0 %v850_v31 }
  0x84   :  { %853 = vmatprep.subr.bf16.mxu0 %v852_v39 }
  0x87   :  { %855 = vmatpush3.bf16.msra.mxu0 %v854_v43 }
  0x88   :  { %857 = vmatprep.subr.bf16.mxu0 %v856_v51 }
  0x8b   :  { %859 = vmatpush3.bf16.msra.mxu0 %v858_v55 }
  0x8c   :  { %861 = vmatprep.subr.bf16.mxu0 %v860_v62 }
  0x8f   :  { %863 = vmatpush3.bf16.msra.mxu0 %v862_v3 }
  0x90   :  { %865 = vmatprep.subr.bf16.mxu0 %v864_v11 }
  0x93   :  { %867 = vmatpush3.bf16.msra.mxu0 %v866_v15 }
  0x94   :  { %869 = vmatprep.subr.bf16.mxu0 %v868_v23 }
  0x97   :  { %871 = vmatpush3.bf16.msra.mxu0 %v870_v27 }
 0x12d   :  { %v189_v28 = vpop.f32.mrb[0].mxu0 }
 0x12e   :  { %v265_v29 = vmul.f32 %v189_v28, %v189_v28  ;;  %v260_v30 = vpop.f32.mrb[0].mxu1  ;;  %v191_v31 = vpop.f32.mrb[1].mxu0 }
 0x12f   :  { %v267_v32 = vmul.f32 %v260_v30, %v260_v30  ;;  %v266_v33 = vmul.f32 %v191_v31, %v191_v31  ;;  %v262_v34 = vpop.f32.mrb[1].mxu1 }
 0x130   :  { %v269_v35 = vmul.f32 %v265_v29, %v189_v28  ;;  %v268_v36 = vmul.f32 %v262_v34, %v262_v34 }
 0x131   :  { %v271_v37 = vmul.f32 %v267_v32, %v260_v30  ;;  %v270_v38 = vmul.f32 %v266_v33, %v191_v31 }
 0x132   :  { %v273_v39 = vmul.f32 0.044715, %v269_v35  ;;  %v272_v40 = vmul.f32 %v268_v36, %v262_v34 }
 0x133   :  { %v275_v41 = vmul.f32 0.044715, %v271_v37  ;;  %v274_v42 = vmul.f32 0.044715, %v270_v38 }
 0x134   :  { %v277_v43 = vadd.f32 %v273_v39, %v189_v28  ;;  %v276_v44 = vmul.f32 0.044715, %v272_v40 }
 0x135   :  { %v279_v45 = vadd.f32 %v275_v41, %v260_v30  ;;  %v278_v46 = vadd.f32 %v274_v42, %v191_v31 }
 0x136   :  { %v281_v47 = vmul.f32 0.7978846, %v277_v43  ;;  %v280_v48 = vadd.f32 %v276_v44, %v262_v34 }
 0x137   :  { %v283_v49 = vmul.f32 0.7978846, %v279_v45  ;;  %v282_v50 = vmul.f32 0.7978846, %v278_v46 }
 0x138   :  { %882 = vtanh.f32 %v281_v47  ;;  %v284_v51 = vmul.f32 0.7978846, %v280_v48 }
 0x139   :  { %884 = vtanh.f32 %v283_v49 }
 0x13a   :  { %886 = vtanh.f32 %v282_v50 }
 0x13b   :  { %888 = vtanh.f32 %v284_v51 }
 0x142   :  { %v883_v52 = vpop.eup %882 }
 0x143   :  { %v885_v53 = vpop.eup %884  ;;  %v289_v54 = vadd.f32 1.0, %v883_v52 }
 0x144   :  { %v887_v55 = vpop.eup %886  ;;  %v291_v56 = vadd.f32 1.0, %v885_v53 }
 0x145   :  { %v889_v57 = vpop.eup %888  ;;  %v290_v58 = vadd.f32 1.0, %v887_v55  ;;  %v293_v59 = vmul.f32 0.5, %v289_v54 }
 0x146   :  { %v292_v0 = vadd.f32 1.0, %v889_v57  ;;  %v295_v60 = vmul.f32 0.5, %v291_v56 }
 0x147   :  { %v294_v61 = vmul.f32 0.5, %v290_v58  ;;  %v297_v1 = vmul.f32 %v293_v59, %v189_v28 }
 0x148   :  { %v296_v62 = vmul.f32 0.5, %v292_v0  ;;  %v299_v3 = vmul.f32 %v295_v60, %v260_v30 }
 0x149   :  { %v298_v63 = vmul.f32 %v294_v61, %v191_v31 }
 0x14a   :  { %v300_v2 = vmul.f32 %v296_v62, %v262_v34 }
 0x14b   :  { %515 = vmatprep.mubr.f32.mxu1 %v298_v63 }
 0x14c   :  { %585 = vmatprep.mubr.f32.mxu0 %v300_v2  ;;  %516 = vmatmul.mubr.f32.vlgmr.msra.gmra.mrb[2].mxu1 %v297_v1 }
 0x14d   :  { %586 = vmatmul.mubr.f32.vlgmr.msra.gmra.mrb[4].mxu0 %v299_v3  ;;  %v447_v4 = vpop.f32.mrb[2].mxu0 }
 0x14e   :  { %v719_v5 = vpop.f32.mrb[3].mxu0 }
 0x21f   :  { %v647_v6 = vpop.f32.mrb[2].mxu1 }
 0x220   :  { %v682_v7 = vpop.f32.mrb[4].mxu0  ;;  %v648_v8 = vpop.f32.mrb[3].mxu1 }
 0x221   :  { %v649_v9 = vadd.f32 %v648_v8, %v647_v6  ;;  %v683_v10 = vpop.f32.mrb[5].mxu0 }
 0x222   :  { %v684_v11 = vadd.f32 %v683_v10, %v682_v7 }
 0x223   :  { %v518_v12 = vadd.f32 %v649_v9, %v447_v4 }
 0x225   :  { %v588_v13 = vadd.f32 %v684_v11, %v518_v12 }
 0x227   :  { %591 = vst [vmem:[%s1050_s4] sm:$0xff] %v588_v13 }
 0x228   :  { %596 = vsyncpa [#allocation3], 1 }
 0x229   :  { %597 = vsyncpa [#allocation5], 1 }

</bundles_post_ra>
